<compile_context>
chip_gen: v6e
topology: v6e:2x2x1
jax: 0.10.0
libtpu: 0.0.40
codegen_flags: <defaults>
</compile_context>

<pallas_src>
import math
import functools

import jax
import jax.numpy as jnp
from jax import lax
from jax.experimental import pallas as pl
from jax.experimental.pallas import tpu as pltpu

_EPS = 1e-12  # matches torch.nn.functional.normalize default eps


def _round_up(x, m):
    return ((x + m - 1) // m) * m


def _round_down(x, m):
    return (x // m) * m


def _l2_normalize_rows(v):
    # v / max(||v||, eps)  ==  v * rsqrt(max(sum(v^2), eps^2))  (up to rounding)
    sumsq = jnp.sum(v * v, axis=-1, keepdims=True)
    return v * lax.rsqrt(jnp.maximum(sumsq, _EPS * _EPS))


def _vmem_capacity_bytes():
    try:
        return int(pltpu.get_tpu_info().vmem_capacity_bytes)
    except Exception:
        return 64 << 20  # conservative v7x-safe fallback


# ------------------------------- kernels -------------------------------------

def _aam_train_kernel(x_ref, w_ref, t_ref, out_ref, *,
                      cos_m, sin_m, margin, scale, tile_l, matmul_dtype):
    j = pl.program_id(1)

    # Row normalization recomputed in-tile: cheap VPU/EUP work hidden under the
    # MXU matmul; avoids any HBM round-trip of normalized copies.
    xn = _l2_normalize_rows(x_ref[...].astype(jnp.float32)).astype(matmul_dtype)
    wn = _l2_normalize_rows(w_ref[...].astype(jnp.float32)).astype(matmul_dtype)

    # [TILE_B, H] x [TILE_L, H] contracting on H -> [TILE_B, TILE_L]; no transpose.
    cosine = lax.dot_general(xn, wn, (((1,), (1,)), ((), ())),
                             preferred_element_type=jnp.float32)

    sine = jnp.sqrt(jnp.clip(1.0 - cosine * cosine, 0.0, 1.0))
    ctm = cosine * cos_m - sine * sin_m
    ctm = jnp.where(cosine > -cos_m, ctm, cosine - margin * sin_m)

    b, l = cosine.shape
    t_local = t_ref[...] - j * tile_l                       # [TILE_B, 1] shift
    col = lax.broadcasted_iota(jnp.int32, (b, l), 1)        # local label id
    one_hot = col == t_local
    out_ref[...] = (jnp.where(one_hot, ctm, cosine) * scale).astype(out_ref.dtype)


def _aam_eval_kernel(x_ref, w_ref, out_ref, *, matmul_dtype):
    xn = _l2_normalize_rows(x_ref[...].astype(jnp.float32)).astype(matmul_dtype)
    wn = _l2_normalize_rows(w_ref[...].astype(jnp.float32)).astype(matmul_dtype)
    out_ref[...] = lax.dot_general(
        xn, wn, (((1,), (1,)), ((), ())),
        preferred_element_type=jnp.float32).astype(out_ref.dtype)


# ------------------------------- wrapper --------------------------------------

def additive_angular_margin_linear(inputs, weight, targets=None, *,
                                   margin=0.2, scale=10.0, training=True,
                                   matmul_dtype=jnp.float32,
                                   max_tile_b=None, max_tile_l=None):
    """JAX/Pallas equivalent of AdditiveAngularMarginLinear.forward.

    inputs : [batch, hidden]
    weight : [num_labels, hidden]
    targets: [batch] int (optional; used only when training=True)
    matmul_dtype: set jnp.bfloat16 (and pass bf16 weights) on v6e/v7x for higher
                  MXU / HBM throughput; accumulation stays f32.
    max_tile_b / max_tile_l: optional caps (testing / manual tuning).
    """
    batch, hidden = inputs.shape
    num_labels, hidden_w = weight.shape
    assert hidden == hidden_w

    x_bytes = jnp.dtype(inputs.dtype).itemsize
    w_bytes = jnp.dtype(weight.dtype).itemsize

    h_pad = _round_up(hidden, 128)            # lane-aligned contraction dim
    b_pad = _round_up(batch, 8)
    l_full = _round_up(num_labels, 128)       # lane-dense unmasked output stores

    vmem_cap = _vmem_capacity_bytes()
    budget = int(vmem_cap * 0.6)              # ~38 MiB on v7x, ~76 MiB on v5e/v6e

    # ---- batch tile: as large as VMEM allows. W is re-streamed from HBM once
    # per batch tile, so bigger tile_b directly cuts the dominant HBM traffic.
    tb_cap = max(8, _round_down((budget // 3) // (2 * h_pad * x_bytes), 8))
    if max_tile_b is not None:
        tb_cap = min(tb_cap, max(8, _round_down(max_tile_b, 8)))
    if b_pad <= min(512, tb_cap):
        tile_b = b_pad                        # single batch tile -> W read once
    else:
        tile_b = max(8, _round_down(min(256, tb_cap), 8))   # MXU-friendly when tiling
        b_pad = _round_up(b_pad, tile_b)

    # ---- label tile: whatever remains of the VMEM budget (double-buffered W +
    # output tiles), preferring large multiples of 256.
    avail = budget - 2 * tile_b * h_pad * x_bytes
    denom = 2 * h_pad * w_bytes + 2 * tile_b * 4
    tl_cap = max(128, _round_down(avail // max(denom, 1), 128))
    if max_tile_l is not None:
        tl_cap = min(tl_cap, max(128, _round_down(max_tile_l, 128)))
    tile_l = min(l_full, 2048, tl_cap)
    if tile_l < l_full and tile_l >= 256:
        tile_l = _round_down(tile_l, 256)
    l_pad = _round_up(l_full, tile_l)

    # ---- zero-pad (zero rows normalize to zero -> zero cosines; cropped at end)
    x_pad = jnp.zeros((b_pad, h_pad), inputs.dtype).at[:batch, :hidden].set(inputs)
    w_pad = jnp.zeros((l_pad, h_pad), weight.dtype).at[:num_labels, :hidden].set(weight)

    # honest VMEM accounting (factors of 2 are the double buffers) + headroom
    vmem_need = (2 * tile_b * h_pad * x_bytes + 2 * tile_l * h_pad * w_bytes
                 + 2 * tile_b * tile_l * 4 + 2 * tile_b * 4)
    vmem_limit = int(min(max(vmem_need + (4 << 20), 16 << 20), vmem_cap - (8 << 20)))

    grid = (b_pad // tile_b, l_pad // tile_l)
    x_spec = pl.BlockSpec((tile_b, h_pad), lambda i, j: (i, 0))
    w_spec = pl.BlockSpec((tile_l, h_pad), lambda i, j: (j, 0))
    o_spec = pl.BlockSpec((tile_b, tile_l), lambda i, j: (i, j))
    out_shape = jax.ShapeDtypeStruct((b_pad, l_pad), jnp.float32)

    cost = pl.CostEstimate(
        flops=2 * b_pad * l_pad * h_pad,
        transcendentals=b_pad * l_pad + b_pad + l_pad,
        bytes_accessed=(b_pad * h_pad * x_bytes * grid[1]
                        + l_pad * h_pad * w_bytes * grid[0]
                        + b_pad * l_pad * 4))

    compiler_params = pltpu.CompilerParams(
        # No cross-iteration scratch -> both axes independent; lets the compiler
        # shard either axis across TensorCores (v7x has 2 TCs).
        dimension_semantics=("parallel", "parallel"),
        vmem_limit_bytes=vmem_limit)

    if training and targets is not None:
        t_pad = jnp.zeros((b_pad, 1), jnp.int32).at[:batch, 0].set(
            targets.astype(jnp.int32))
        kernel = functools.partial(
            _aam_train_kernel, cos_m=math.cos(margin), sin_m=math.sin(margin),
            margin=margin, scale=scale, tile_l=tile_l, matmul_dtype=matmul_dtype)
        t_spec = pl.BlockSpec((tile_b, 1), lambda i, j: (i, 0))
        logits = pl.pallas_call(
            kernel, out_shape=out_shape, grid=grid,
            in_specs=[x_spec, w_spec, t_spec], out_specs=o_spec,
            compiler_params=compiler_params, cost_estimate=cost,
        )(x_pad, w_pad, t_pad)
    else:
        kernel = functools.partial(_aam_eval_kernel, matmul_dtype=matmul_dtype)
        logits = pl.pallas_call(
            kernel, out_shape=out_shape, grid=grid,
            in_specs=[x_spec, w_spec], out_specs=o_spec,
            compiler_params=compiler_params, cost_estimate=cost,
        )(x_pad, w_pad)

    # TODO(synk): if the consumer can take padded (b_pad, l_pad) logits, skip this crop.
    return logits[:batch, :num_labels]


# ------------------------------- reference -----------------------------------

def _reference(inputs, weight, targets, margin, scale, training):
    # pure-JAX reference mirroring the PyTorch module
    def norm(v):
        n = jnp.sqrt(jnp.sum(v * v, axis=-1, keepdims=True))
        return v / jnp.maximum(n, _EPS)
    xn, wn = norm(inputs), norm(weight)
    cosine = xn @ wn.T
    if training and targets is not None:
        cos_m, sin_m = math.cos(margin), math.sin(margin)
        sine = jnp.sqrt(jnp.clip(1.0 - cosine * cosine, 0.0, 1.0))
        ctm = cosine * cos_m - sine * sin_m
        ctm = jnp.where(cosine > -cos_m, ctm, cosine - margin * sin_m)
        one_hot = jax.nn.one_hot(targets, cosine.shape[1], dtype=cosine.dtype)
        return jnp.where(one_hot == 1, ctm, cosine) * scale
    return cosine


if __name__ == "__main__":
    margin, scale = 0.2, 10.0
    key = jax.random.PRNGKey(0)

    def xavier_uniform(k, shape):
        fan_out, fan_in = shape
        bound = math.sqrt(6.0 / (fan_in + fan_out))
        return jax.random.uniform(k, shape, jnp.float32, -bound, bound)

    # case 1: tiny aligned-ish demo shapes (single tile both axes)
    # case 2: non-aligned shapes, auto tiling (single label tile on real VMEM budgets)
    # case 3: forced small tiles -> exercises a full 2-D (batch x label) grid
    cases = [
        dict(batch=8, hidden=32, num_labels=16),
        dict(batch=10, hidden=96, num_labels=700),
        dict(batch=20, hidden=96, num_labels=700, max_tile_b=8, max_tile_l=256),
    ]

    for c in cases:
        k_x, k_w, k_t, key = jax.random.split(key, 4)
        x = jax.random.normal(k_x, (c["batch"], c["hidden"]), dtype=jnp.float32)
        w = xavier_uniform(k_w, (c["num_labels"], c["hidden"]))
        t = jax.random.randint(k_t, (c["batch"],), 0, c["num_labels"], dtype=jnp.int32)
        tiles = dict(max_tile_b=c.get("max_tile_b"), max_tile_l=c.get("max_tile_l"))

        got_train = additive_angular_margin_linear(
            x, w, t, margin=margin, scale=scale, training=True, **tiles)
        got_eval = additive_angular_margin_linear(
            x, w, None, margin=margin, scale=scale, training=False, **tiles)
        jax.block_until_ready((got_train, got_eval))

        ref_train = _reference(x, w, t, margin, scale, True)
        ref_eval = _reference(x, w, None, margin, scale, False)

        assert got_train.shape == ref_train.shape
        assert got_eval.shape == ref_eval.shape
        assert jnp.allclose(got_train, ref_train, atol=1e-5, rtol=1e-5)
        assert jnp.allclose(got_eval, ref_eval, atol=1e-5, rtol=1e-5)

    print("KERNEL_OK")
</pallas_src>

<mosaic_0001>
module attributes {stable_mosaic.version = 11 : i64} {
  func.func @_aam_train_kernel(%arg0: i32, %arg1: i32, %arg2: memref<8x128xf32, #tpu.memory_space<vmem>>, %arg3: memref<128x128xf32, #tpu.memory_space<vmem>>, %arg4: memref<8x1xi32, #tpu.memory_space<vmem>>, %arg5: memref<8x128xf32, #tpu.memory_space<vmem>>) attributes {dimension_semantics = [#tpu.dimension_semantics<parallel>, #tpu.dimension_semantics<parallel>], iteration_bounds = array<i64: 1, 1>, scalar_prefetch = 0 : i64, scratch_operands = 0 : i64, tpu.core_type = #tpu.core_type<tc>, window_params = [{transform_indices = @transform_0, window_bounds = array<i64: 8, 128>}, {transform_indices = @transform_1, window_bounds = array<i64: 128, 128>}, {transform_indices = @transform_2, window_bounds = array<i64: 8, 1>}, {transform_indices = @transform_3, window_bounds = array<i64: 8, 128>}]} {
    %c0 = arith.constant 0 : index
    %c0_0 = arith.constant 0 : index
    %0 = vector.load %arg2[%c0, %c0_0] : memref<8x128xf32, #tpu.memory_space<vmem>>, vector<8x128xf32>
    %1 = arith.mulf %0, %0 : vector<8x128xf32>
    %cst = arith.constant dense<0.000000e+00> : vector<8xf32>
    %2 = vector.multi_reduction <add>, %1, %cst [1] : vector<8x128xf32> to vector<8xf32>
    %3 = vector.shape_cast %2 : vector<8xf32> to vector<8x1xf32>
    %cst_1 = arith.constant 1.000000e-24 : f32
    %4 = vector.broadcast %cst_1 : f32 to vector<8x1xf32>
    %5 = arith.maximumf %3, %4 : vector<8x1xf32>
    %6 = math.rsqrt %5 : vector<8x1xf32>
    %7 = vector.broadcast %6 : vector<8x1xf32> to vector<8x128xf32>
    %8 = arith.mulf %0, %7 : vector<8x128xf32>
    %c0_2 = arith.constant 0 : index
    %c0_3 = arith.constant 0 : index
    %9 = vector.load %arg3[%c0_2, %c0_3] : memref<128x128xf32, #tpu.memory_space<vmem>>, vector<128x128xf32>
    %10 = arith.mulf %9, %9 : vector<128x128xf32>
    %cst_4 = arith.constant dense<0.000000e+00> : vector<128xf32>
    %11 = vector.multi_reduction <add>, %10, %cst_4 [1] : vector<128x128xf32> to vector<128xf32>
    %12 = vector.shape_cast %11 : vector<128xf32> to vector<128x1xf32>
    %cst_5 = arith.constant 1.000000e-24 : f32
    %13 = vector.broadcast %cst_5 : f32 to vector<128x1xf32>
    %14 = arith.maximumf %12, %13 : vector<128x1xf32>
    %15 = math.rsqrt %14 : vector<128x1xf32>
    %16 = vector.broadcast %15 : vector<128x1xf32> to vector<128x128xf32>
    %17 = arith.mulf %9, %16 : vector<128x128xf32>
    %cst_6 = arith.constant dense<0.000000e+00> : vector<8x128xf32>
    %18 = tpu.matmul %8, %17, %cst_6 {dimension_numbers = #tpu.dot_dimension_numbers<[1], [1], [0], [0], [0, 0, 1, 0], [], []>} : vector<8x128xf32>, vector<128x128xf32>, vector<8x128xf32> -> vector<8x128xf32>
    %19 = arith.mulf %18, %18 : vector<8x128xf32>
    %cst_7 = arith.constant 1.000000e+00 : f32
    %20 = vector.broadcast %cst_7 : f32 to vector<8x128xf32>
    %21 = arith.subf %20, %19 : vector<8x128xf32>
    %cst_8 = arith.constant 0.000000e+00 : f32
    %cst_9 = arith.constant 1.000000e+00 : f32
    %22 = vector.broadcast %cst_8 : f32 to vector<8x128xf32>
    %23 = arith.maximumf %22, %21 : vector<8x128xf32>
    %24 = vector.broadcast %cst_9 : f32 to vector<8x128xf32>
    %25 = arith.minimumf %24, %23 : vector<8x128xf32>
    %26 = math.sqrt %25 : vector<8x128xf32>
    %cst_10 = arith.constant 0.980066597 : f32
    %27 = vector.broadcast %cst_10 : f32 to vector<8x128xf32>
    %28 = arith.mulf %18, %27 : vector<8x128xf32>
    %cst_11 = arith.constant 0.198669329 : f32
    %29 = vector.broadcast %cst_11 : f32 to vector<8x128xf32>
    %30 = arith.mulf %26, %29 : vector<8x128xf32>
    %31 = arith.subf %28, %30 : vector<8x128xf32>
    %cst_12 = arith.constant -0.980066597 : f32
    %32 = vector.broadcast %cst_12 : f32 to vector<8x128xf32>
    %33 = arith.cmpf ogt, %18, %32 : vector<8x128xf32>
    %cst_13 = arith.constant 0.0397338644 : f32
    %34 = vector.broadcast %cst_13 : f32 to vector<8x128xf32>
    %35 = arith.subf %18, %34 : vector<8x128xf32>
    %36 = arith.select %33, %31, %35 : vector<8x128xi1>, vector<8x128xf32>
    %c0_14 = arith.constant 0 : index
    %c0_15 = arith.constant 0 : index
    %37 = vector.load %arg4[%c0_14, %c0_15] : memref<8x1xi32, #tpu.memory_space<vmem>>, vector<8x1xi32>
    %c128_i32 = arith.constant 128 : i32
    %38 = arith.muli %arg1, %c128_i32 : i32
    %39 = vector.broadcast %38 : i32 to vector<8x1xi32>
    %40 = arith.subi %37, %39 : vector<8x1xi32>
    %41 = tpu.iota {dimensions = array<i32: 1>} : vector<8x128xi32>
    %42 = vector.broadcast %40 : vector<8x1xi32> to vector<8x128xi32>
    %43 = arith.cmpi eq, %41, %42 : vector<8x128xi32>
    %44 = arith.select %43, %36, %18 : vector<8x128xi1>, vector<8x128xf32>
    %cst_16 = arith.constant 1.000000e+01 : f32
    %45 = vector.broadcast %cst_16 : f32 to vector<8x128xf32>
    %46 = arith.mulf %44, %45 : vector<8x128xf32>
    %c0_17 = arith.constant 0 : index
    %c0_18 = arith.constant 0 : index
    %47 = vector.load %arg5[%c0_17, %c0_18] : memref<8x128xf32, #tpu.memory_space<vmem>>, vector<8x128xf32>
    tpu.vector_store %arg5[%c0_17, %c0_18], %46 {strides = array<i32>} : memref<8x128xf32, #tpu.memory_space<vmem>>, vector<8x128xf32>,
    return
  }
  func.func @transform_0(%arg0: i32, %arg1: i32) -> (i32, i32) {
    %c0_i32 = arith.constant 0 : i32
    %c0_i32_0 = arith.constant 0 : i32
    return %arg0, %c0_i32 : i32, i32
  }
  func.func @transform_1(%arg0: i32, %arg1: i32) -> (i32, i32) {
    %c0_i32 = arith.constant 0 : i32
    %c0_i32_0 = arith.constant 0 : i32
    return %arg1, %c0_i32 : i32, i32
  }
  func.func @transform_2(%arg0: i32, %arg1: i32) -> (i32, i32) {
    %c0_i32 = arith.constant 0 : i32
    %c0_i32_0 = arith.constant 0 : i32
    return %arg0, %c0_i32 : i32, i32
  }
  func.func @transform_3(%arg0: i32, %arg1: i32) -> (i32, i32) {
    %c0_i32 = arith.constant 0 : i32
    return %arg0, %arg1 : i32, i32
  }
}

</mosaic_0001>

<bundles_post_ra>
// kernel: tpu_custom_call.1
= control target key start
LH: loop header
LB: loop body
LE: loop exit
PB: predicated region body
PF: predicated region fallthrough
CT: control target
= control target key end

     0   :  { %8 = vsyncpa [#allocation3], 0  ;;  %s546_s0 = inlined_call_operand.vmem [shape: f32[8,128], index: 0, kind: input, shape index: {}]   ;;  %s547_s1 = inlined_call_operand.hbm [shape: f32[128,128], index: 1, kind: input, shape index: {}]   ;;  %s548_s2 = inlined_call_operand.vmem [shape: s32[8,1], index: 2, kind: input, shape index: {}]   ;;  %s549_s3 = inlined_call_operand.hbm [shape: f32[8,128], index: 3, kind: output, shape index: {}]  }
   0x1   :  { %9 = vsyncpa [#allocation4], 0  ;;  %s405_s12 = smov [#allocation2]  }
   0x2   :  { %s17_s13 = sshll.u32 %s405_s12, 4  ;;  %s18_s13 = int_to_ptr.vmem [resolvable:$true] %s17_s13 }
   0x3   :  { %s369_s14 = scalar_lea.vmem %s18_s13, 2048  ;;  %p374_p1 = scmp.lt.s32.totalorder %s18_s13, %s18_s13 }
   0x4   :  { %p370_p0 = scmp.ne.s32.totalorder %s18_s13, %s369_s14  ;;  %p375_p2 = scmp.lt.s32.totalorder %s369_s14, %s369_s14 }
   0x6   :  { %p376_p3 = por %p375_p2, %p374_p1 }
   0x8   :  { %p377_p4 = pnand %p376_p3, %p370_p0 }
   0xa   :  { %380 = shalt.err (!%p377_p4)
}
   0xb   :  { %s406_s15 = smov 128   ;;  %s407_s16 = smov 8  }
   0xc   :  { %23 = dma.hbm_to_vmem [thread:$0]  %s547_s1, 2048, %s18_s13, [#allocation3], %s406_s15, %s406_s15, %s407_s16  }
   0xd   :  { %401 = dma.done.wait [#allocation3], 2048  }
   0xe   :  { %402 = vsyncadd [#allocation3], 4294965248  ;;  %v435_v0 = vld [vmem:[#allocation2 + $0x78] sm:$0xff]  ;;  %v437_v1 = vld [vmem:[#allocation2 + $0x70] sm:$0xff]  ;;  %v408_v30 = vmov 0.0   ;;  %vm409_vm0 = vmmov 0  }
   0xf   :  { %v439_v2 = vld [vmem:[#allocation2 + $0x68] sm:$0xff]  ;;  %v67_v3 = vmul.f32 %v435_v0, %v435_v0  ;;  %v445_v5 = vld [vmem:[#allocation2 + $0x60] sm:$0xff]  ;;  %v66_v6 = vmul.f32 %v437_v1, %v437_v1  ;;  %v451_v8 = vld [vmem:[#allocation2 + $0x58] sm:$0xff]  ;;  %281 = vmatprep.subr.mxu0 %v408_v30  ;;  %313 = vmatprep.mubr.msk.f32.mxu0 %vm409_vm0, %v408_v30  ;;  %v410_v36 = vmov 0  }
  0x10   :  { %v65_v4 = vmul.f32 %v439_v2, %v439_v2  ;;  %v64_v7 = vmul.f32 %v445_v5, %v445_v5  ;;  %v453_v9 = vld [vmem:[#allocation2 + $0x50] sm:$0xff]  ;;  %v63_v10 = vmul.f32 %v451_v8, %v451_v8  ;;  %v459_v12 = vld [vmem:[#allocation2 + $0x48] sm:$0xff]  ;;  %v461_v13 = vld [vmem:[#allocation2 + $0x40] sm:$0xff]  ;;  %323 = vset.pattern.permute.xlu1 %v410_v36  ;;  %324 = vset.pattern.permute.xlu0 %v410_v36 }
  0x11   :  { %98 = vadd.xlane.f32.xlu0 %v67_v3  ;;  %v62_v11 = vmul.f32 %v453_v9, %v453_v9  ;;  %v61_v14 = vmul.f32 %v459_v12, %v459_v12  ;;  %v60_v15 = vmul.f32 %v461_v13, %v461_v13  ;;  %v467_v16 = vld [vmem:[#allocation2 + $0x38] sm:$0xff]  ;;  %v469_v17 = vld [vmem:[#allocation2 + $0x30] sm:$0xff]  ;;  %v475_v20 = vld [vmem:[#allocation2 + $0x28] sm:$0xff] }
  0x12   :  { %94 = vadd.xlane.f32.xlu1 %v65_v4  ;;  %v59_v18 = vmul.f32 %v467_v16, %v467_v16  ;;  %v58_v19 = vmul.f32 %v469_v17, %v469_v17  ;;  %v477_v21 = vld [vmem:[#allocation2 + $0x20] sm:$0xff]  ;;  %v57_v22 = vmul.f32 %v475_v20, %v475_v20  ;;  %v483_v24 = vld [vmem:[#allocation2 + $0x18] sm:$0xff]  ;;  %v485_v25 = vld [vmem:[#allocation2 + $0x10] sm:$0xff] }
  0x13   :  { %v56_v23 = vmul.f32 %v477_v21, %v477_v21  ;;  %v55_v26 = vmul.f32 %v483_v24, %v483_v24  ;;  %v54_v27 = vmul.f32 %v485_v25, %v485_v25  ;;  %v491_v28 = vld [vmem:[#allocation2 + $0x8] sm:$0xff]  ;;  %v493_v29 = vld [vmem:[#allocation2] sm:$0xff] }
  0x14   :  { %v53_v31 = vmul.f32 %v491_v28, %v491_v28  ;;  %v52_v32 = vmul.f32 %v493_v29, %v493_v29  ;;  %v503_v33 = vld [vmem:[%s546_s0] sm:$0xff]  ;;  %s411_s0 = smov [#allocation5]  }
  0x15   :  { %96 = vadd.xlane.f32.xlu0 %v66_v6  ;;  %v30_v34 = vmul.f32 %v503_v33, %v503_v33  ;;  %v235_v35 = vld [vmem:[%s548_s2] sm:$0xff]  ;;  %s254_s2 = sshll.u32 %s411_s0, 4  ;;  %s255_s2 = int_to_ptr.vmem [resolvable:$true] %s254_s2 }
  0x16   :  { %92 = vadd.xlane.f32.xlu1 %v64_v7  ;;  %s381_s22 = scalar_lea.vmem %s255_s2, 128  ;;  %p386_p6 = scmp.lt.s32.totalorder %s255_s2, %s255_s2 }
  0x17   :  { %p382_p5 = scmp.ne.s32.totalorder %s255_s2, %s381_s22  ;;  %p387_p7 = scmp.lt.s32.totalorder %s381_s22, %s381_s22 }
  0x19   :  { %90 = vadd.xlane.f32.xlu0 %v63_v10  ;;  %p388_p8 = por %p387_p7, %p386_p6 }
  0x1a   :  { %88 = vadd.xlane.f32.xlu1 %v62_v11 }
  0x1b   :  { %p389_p9 = pnand %p388_p8, %p382_p5 }
  0x1d   :  { %86 = vadd.xlane.f32.xlu0 %v61_v14 }
  0x1e   :  { %84 = vadd.xlane.f32.xlu1 %v60_v15 }
  0x21   :  { %82 = vadd.xlane.f32.xlu0 %v59_v18 }
  0x22   :  { %80 = vadd.xlane.f32.xlu1 %v58_v19 }
  0x25   :  { %78 = vadd.xlane.f32.xlu0 %v57_v22 }
  0x26   :  { %76 = vadd.xlane.f32.xlu1 %v56_v23 }
  0x29   :  { %74 = vadd.xlane.f32.xlu0 %v55_v26 }
  0x2a   :  { %72 = vadd.xlane.f32.xlu1 %v54_v27 }
  0x2d   :  { %70 = vadd.xlane.f32.xlu0 %v53_v31 }
  0x2e   :  { %68 = vadd.xlane.f32.xlu1 %v52_v32 }
  0x31   :  { %31 = vadd.xlane.f32.xlu0 %v30_v34 }
  0x3f   :  { %242 = vperm.xlu1 %323, %v235_v35  }
  0x9a   :  { %v99_v37 = vpop.xlane.xlu0 %98 }
  0x9b   :  { %v95_v38 = vpop.xlane.xlu1 %94  ;;  %v115_v39 = vmax.f32 %v99_v37, 1e-24 }
  0x9c   :  { %v113_v40 = vmax.f32 %v95_v38, 1e-24 }
  0x9d   :  { %325 = vrsqrt.f32 %v115_v39 }
  0x9e   :  { %v97_v41 = vpop.xlane.xlu0 %96  ;;  %327 = vrsqrt.f32 %v113_v40 }
  0x9f   :  { %v93_v42 = vpop.xlane.xlu1 %92  ;;  %v114_v43 = vmax.f32 %v97_v41, 1e-24 }
  0xa0   :  { %v112_v44 = vmax.f32 %v93_v42, 1e-24 }
  0xa1   :  { %329 = vrsqrt.f32 %v114_v43 }
  0xa2   :  { %v91_v45 = vpop.xlane.xlu0 %90  ;;  %331 = vrsqrt.f32 %v112_v44 }
  0xa3   :  { %v111_v46 = vmax.f32 %v91_v45, 1e-24  ;;  %v89_v47 = vpop.xlane.xlu1 %88 }
  0xa4   :  { %v110_v48 = vmax.f32 %v89_v47, 1e-24 }
  0xa5   :  { %333 = vrsqrt.f32 %v111_v46 }
  0xa6   :  { %v87_v50 = vpop.xlane.xlu0 %86  ;;  %335 = vrsqrt.f32 %v110_v48 }
  0xa7   :  { %v109_v53 = vmax.f32 %v87_v50, 1e-24  ;;  %v85_v55 = vpop.xlane.xlu1 %84 }
  0xa8   :  { %v108_v58 = vmax.f32 %v85_v55, 1e-24 }
  0xa9   :  { %337 = vrsqrt.f32 %v109_v53 }
  0xaa   :  { %v326_v49 = vpop.eup %325  ;;  %v83_v60 = vpop.xlane.xlu0 %82  ;;  %339 = vrsqrt.f32 %v108_v58 }
  0xab   :  { %v147_v51 = vmul.f32 %v326_v49, %v435_v0  ;;  %v328_v52 = vpop.eup %327  ;;  %v107_v62 = vmax.f32 %v83_v60, 1e-24  ;;  %v81_v0 = vpop.xlane.xlu1 %80 }
  0xac   :  { %v145_v57 = vmul.f32 %v328_v52, %v439_v2  ;;  %v106_v3 = vmax.f32 %v81_v0, 1e-24 }
  0xad   :  { %282 = vmatpush3.xpose.msra.mxu0 %v147_v51  ;;  %341 = vrsqrt.f32 %v107_v62 }
  0xae   :  { %v330_v54 = vpop.eup %329  ;;  %283 = vmatprep.subr.mxu0 %v408_v30  ;;  %v79_v4 = vpop.xlane.xlu0 %78  ;;  %343 = vrsqrt.f32 %v106_v3 }
  0xaf   :  { %v146_v56 = vmul.f32 %v330_v54, %v437_v1  ;;  %v332_v59 = vpop.eup %331  ;;  %v105_v7 = vmax.f32 %v79_v4, 1e-24  ;;  %v77_v10 = vpop.xlane.xlu1 %76 }
  0xb0   :  { %v144_v61 = vmul.f32 %v332_v59, %v445_v5  ;;  %v104_v14 = vmax.f32 %v77_v10, 1e-24 }
  0xb1   :  { %284 = vmatpush3.xpose.msra.mxu0 %v146_v56  ;;  %345 = vrsqrt.f32 %v105_v7 }
  0xb2   :  { %285 = vmatprep.subr.mxu0 %v408_v30  ;;  %v334_v63 = vpop.eup %333  ;;  %v75_v15 = vpop.xlane.xlu0 %74  ;;  %347 = vrsqrt.f32 %v104_v14 }
  0xb3   :  { %v143_v1 = vmul.f32 %v334_v63, %v451_v8  ;;  %v336_v2 = vpop.eup %335  ;;  %v103_v19 = vmax.f32 %v75_v15, 1e-24  ;;  %v73_v22 = vpop.xlane.xlu1 %72 }
  0xb4   :  { %v142_v6 = vmul.f32 %v336_v2, %v453_v9  ;;  %v102_v26 = vmax.f32 %v73_v22, 1e-24 }
  0xb5   :  { %286 = vmatpush3.xpose.msra.mxu0 %v145_v57  ;;  %349 = vrsqrt.f32 %v103_v19 }
  0xb6   :  { %287 = vmatprep.subr.mxu0 %v408_v30  ;;  %v338_v5 = vpop.eup %337  ;;  %v71_v27 = vpop.xlane.xlu0 %70  ;;  %351 = vrsqrt.f32 %v102_v26 }
  0xb7   :  { %v141_v11 = vmul.f32 %v338_v5, %v459_v12  ;;  %v340_v8 = vpop.eup %339  ;;  %v101_v32 = vmax.f32 %v71_v27, 1e-24  ;;  %v69_v34 = vpop.xlane.xlu1 %68 }
  0xb8   :  { %v140_v18 = vmul.f32 %v340_v8, %v461_v13  ;;  %v100_v36 = vmax.f32 %v69_v34, 1e-24 }
  0xb9   :  { %288 = vmatpush3.xpose.msra.mxu0 %v144_v61  ;;  %353 = vrsqrt.f32 %v101_v32 }
  0xba   :  { %289 = vmatprep.subr.mxu0 %v408_v30  ;;  %v342_v9 = vpop.eup %341  ;;  %355 = vrsqrt.f32 %v100_v36 }
  0xbb   :  { %v139_v23 = vmul.f32 %v342_v9, %v467_v16  ;;  %v344_v12 = vpop.eup %343  ;;  %v32_v16 = vpop.xlane.xlu0 %31 }
  0xbc   :  { %v138_v31 = vmul.f32 %v344_v12, %v469_v17  ;;  %v33_v38 = vmax.f32 %v32_v16, 1e-24 }
  0xbd   :  { %290 = vmatpush3.xpose.msra.mxu0 %v143_v1 }
  0xbe   :  { %291 = vmatprep.subr.mxu0 %v408_v30  ;;  %v346_v13 = vpop.eup %345  ;;  %357 = vrsqrt.f32 %v33_v38 }
  0xbf   :  { %v137_v35 = vmul.f32 %v346_v13, %v475_v20  ;;  %v348_v37 = vpop.eup %347 }
  0xc0   :  { %v136_v39 = vmul.f32 %v348_v37, %v477_v21 }
  0xc1   :  { %292 = vmatpush3.xpose.msra.mxu0 %v142_v6 }
  0xc2   :  { %293 = vmatprep.subr.mxu0 %v408_v30  ;;  %v350_v17 = vpop.eup %349 }
  0xc3   :  { %v135_v40 = vmul.f32 %v350_v17, %v483_v24  ;;  %v352_v41 = vpop.eup %351 }
  0xc4   :  { %v134_v20 = vmul.f32 %v352_v41, %v485_v25 }
  0xc5   :  { %294 = vmatpush3.xpose.msra.mxu0 %v141_v11 }
  0xc6   :  { %295 = vmatprep.subr.mxu0 %v408_v30  ;;  %v354_v42 = vpop.eup %353 }
  0xc7   :  { %v133_v43 = vmul.f32 %v354_v42, %v491_v28  ;;  %v356_v21 = vpop.eup %355  ;;  %v239_v28 = vlaneseq }
  0xc8   :  { %v132_v45 = vmul.f32 %v356_v21, %v493_v29 }
  0xc9   :  { %296 = vmatpush3.xpose.msra.mxu0 %v140_v18  ;;  %v240_v54 = vand.u32 127, %v239_v28 }
  0xca   :  { %297 = vmatprep.subr.mxu0 %v408_v30 }
  0xcb   :  { %v358_v44 = vpop.eup %357 }
  0xcc   :  { %v35_v24 = vmul.f32 %v358_v44, %v503_v33 }
  0xcd   :  { %298 = vmatpush3.xpose.msra.mxu0 %v139_v23 }
  0xce   :  { %299 = vmatprep.subr.mxu0 %v408_v30 }
  0xd1   :  { %300 = vmatpush3.xpose.msra.mxu0 %v138_v31 }
  0xd2   :  { %301 = vmatprep.subr.mxu0 %v408_v30 }
  0xd5   :  { %302 = vmatpush3.xpose.msra.mxu0 %v137_v35 }
  0xd6   :  { %303 = vmatprep.subr.mxu0 %v408_v30 }
  0xd9   :  { %304 = vmatpush3.xpose.msra.mxu0 %v136_v39 }
  0xda   :  { %305 = vmatprep.subr.mxu0 %v408_v30 }
  0xdd   :  { %306 = vmatpush3.xpose.msra.mxu0 %v135_v40 }
  0xde   :  { %307 = vmatprep.subr.mxu0 %v408_v30 }
  0xe1   :  { %308 = vmatpush3.xpose.msra.mxu0 %v134_v20 }
  0xe2   :  { %309 = vmatprep.subr.mxu0 %v408_v30 }
  0xe5   :  { %310 = vmatpush3.xpose.msra.mxu0 %v133_v43 }
  0xe6   :  { %311 = vmatprep.subr.mxu0 %v408_v30  ;;  %v243_v30 = vpop.permute.xlu1 %242 }
  0xe7   :  { %vm244_vm3 = vcmp.eq.s32.totalorder %v240_v54, %v243_v30 }
  0xe9   :  { %312 = vmatpush3.xpose.msra.mxu0 %v132_v45 }
  0xec   :  { %314 = vmatmul.mubr.f32.vlgmr.msra.gmra.mxu0 %v35_v24 }
 0x1ac   :  { %v214_v25 = vpop.f32.mrf.mxu0 }
 0x1ad   :  { %v218_v46 = vmul.f32 %v214_v25, %v214_v25  ;;  %v229_v33 = vmul.f32 0.9800666, %v214_v25  ;;  %v263_v57 = vadd.f32 -0.039733864, %v214_v25  ;;  %vm232_vm4 = vcmp.gt.f32.partialorder %v214_v25, -0.9800666 }
 0x1ae   :  { %v315_v47 = vpop.f32.mrf.mxu0 }
 0x1af   :  { %v219_v48 = vsub.f32 1.0, %v218_v46 }
 0x1b1   :  { %v220_v49 = vmax.f32 %v219_v48, 0.0 }
 0x1b3   :  { %v221_v50 = vmin.f32 %v220_v49, 1.0 }
 0x1b5   :  { %359 = vrsqrt.f32 %v221_v50  ;;  %vm224_vm1 = vcmp.eq.f32.partialorder %v221_v50, inf  ;;  %v227_v53 = vand.u32 2147483648, %v221_v50  ;;  %vm226_vm2 = vcmp.eq.f32.partialorder %v221_v50, 0.0 }
 0x1c2   :  { %v360_v51 = vpop.eup %359 }
 0x1c3   :  { %v223_v52 = vmul.f32 %v360_v51, %v221_v50 }
 0x1c5   :  { %v225_v29 = vsel %vm224_vm1, %v221_v50, %v223_v52 }
 0x1c6   :  { %v228_v55 = vsel %vm226_vm2, %v227_v53, %v225_v29 }
 0x1c7   :  { %v230_v56 = vmul.f32 0.19866933, %v228_v55 }
 0x1c9   :  { %v231_v58 = vsub.f32 %v229_v33, %v230_v56 }
 0x1cb   :  { %v234_v59 = vsel %vm232_vm4, %v231_v58, %v263_v57 }
 0x1cc   :  { %v245_v60 = vsel %vm244_vm3, %v234_v59, %v214_v25 }
 0x1cd   :  { %v246_v61 = vmul.f32 10.0, %v245_v60 }
 0x1cf   :  { %247 = vst [vmem:[#allocation5] sm:$0xff] %v246_v61 }
 0x1d0   :  { %392 = shalt.err (!%p389_p9)
}
 0x1d1   :  { %257 = dma.vmem_to_hbm [thread:$0]  %s255_s2, 128, %s549_s3, [#allocation4]  }
 0x1d2   :  { %403 = dma.done.wait [#allocation4], 128  }
 0x1d3   :  { %404 = vsyncadd [#allocation4], 4294967168 }
 0x1d4   :  { %261 = vsyncpa [#allocation3], 1 }
 0x1d5   :  { %262 = vsyncpa [#allocation4], 1 }

</bundles_post_ra>
